<compile_context>
chip_gen: v7x
topology: tpu7x:2x2x1
jax: 0.10.0
libtpu: 0.0.40
codegen_flags: <defaults>
</compile_context>

<pallas_src>
import functools

import jax
import jax.numpy as jnp
import numpy as np
from jax.experimental import pallas as pl
from jax.experimental.pallas import tpu as pltpu


def encoder_bert_kernel(ids_ref, table_ref, hidden_ref, last_ref, rows_ref, sems,
                        *, tokens_per_block, seq_len):
    """One batch-block grid step.

    ids_ref:    (B*S,) int32 token ids in SMEM (scalar prefetch)
    table_ref:  (V, E) float32 embedding table, left in HBM (pl.ANY)
    hidden_ref: (b_block, S, E) float32 output block (VMEM)
    last_ref:   (b_block, 1, E) float32 mean over the sequence axis (VMEM)
    rows_ref:   (b_block*S, E) float32 VMEM scratch holding the gathered rows
    sems:       (b_block*S,) DMA semaphores, one per in-flight row copy
    """
    b = pl.program_id(0)
    base = b * tokens_per_block

    # Issue one row-gather DMA per token; all tokens_per_block copies are in flight
    # simultaneously, so only ~one DMA round-trip of latency is exposed per step.
    for t in range(tokens_per_block):
        tok = ids_ref[base + t]
        pltpu.make_async_copy(
            table_ref.at[pl.ds(tok, 1), :],
            rows_ref.at[pl.ds(t, 1), :],
            sems.at[t],
        ).start()

    # Wait for every gathered row (descriptor shape/semaphore is what matters for wait).
    for t in range(tokens_per_block):
        pltpu.make_async_copy(
            table_ref.at[pl.ds(0, 1), :],
            rows_ref.at[pl.ds(t, 1), :],
            sems.at[t],
        ).wait()

    rows = rows_ref[...]                              # (b_block*S, E), already in VMEM
    b_block, _, embed = hidden_ref.shape

    # 'linear' activation == identity; single dense (b_block*S, E) store.
    hidden_ref[...] = rows.reshape(hidden_ref.shape)

    # Mean over the sequence axis (matches output.mean(1), padding rows included):
    # one cheap sublane reduce over data already resident in vregs/VMEM.
    h = rows.reshape(b_block, seq_len, embed)
    last_ref[...] = jnp.mean(h, axis=1, keepdims=True)


def encoder_bert_forward(seq, table, *, b_block=1):
    """seq: (B, S) int token ids; table: (V, E) float32 embedding matrix.

    Returns (hidden, last_hidden) == (activation(embedding), mean over axis 1).
    """
    B, S = seq.shape
    V, E = table.shape
    assert B % b_block == 0, "b_block must divide batch"
    assert E % 128 == 0, "embed dim must be lane-aligned"

    tokens_per_block = b_block * S
    ids = seq.reshape(-1).astype(jnp.int32)

    kernel = functools.partial(
        encoder_bert_kernel, tokens_per_block=tokens_per_block, seq_len=S)

    # Gather-only kernel: zero FLOPs, bytes proportional to the output, not the vocab.
    cost = pl.CostEstimate(
        flops=0,
        transcendentals=0,
        bytes_accessed=2 * B * S * E * 4 + B * S * 4 + B * E * 4,
    )

    hidden, last = pl.pallas_call(
        kernel,
        out_shape=(
            jax.ShapeDtypeStruct((B, S, E), table.dtype),   # hidden
            jax.ShapeDtypeStruct((B, 1, E), table.dtype),   # last_hidden (3-D for tiling)
        ),
        grid_spec=pltpu.PrefetchScalarGridSpec(
            num_scalar_prefetch=1,                           # ids -> SMEM
            grid=(B // b_block,),                            # parallel batch axis (v7x: 2 TCs)
            in_specs=[
                pl.BlockSpec(memory_space=pl.ANY),           # table stays in HBM, manual DMA
            ],
            out_specs=[
                pl.BlockSpec((b_block, S, E), lambda b, ids: (b, 0, 0)),
                pl.BlockSpec((b_block, 1, E), lambda b, ids: (b, 0, 0)),
            ],
            scratch_shapes=[
                pltpu.VMEM((tokens_per_block, E), table.dtype),
                pltpu.SemaphoreType.DMA((tokens_per_block,)),
            ],
        ),
        compiler_params=pltpu.CompilerParams(
            dimension_semantics=("parallel",)),
        cost_estimate=cost,
    )(ids, table)

    return hidden, last[:, 0, :]


if __name__ == "__main__":
    key = jax.random.PRNGKey(0)
    k_table, k_seq = jax.random.split(key)

    # EncoderBERT hardcodes embed_size = 512; keep other dims small.
    B, S, V, E = 2, 8, 96, 512

    table = 0.02 * jax.random.normal(k_table, (V, E), dtype=jnp.float32)
    table = table.at[0, :].set(0.0)                       # padding_idx = 0
    seq = jax.random.randint(k_seq, (B, S), 0, V, dtype=jnp.int32)

    # b_block=1 -> 2 independent "parallel" grid steps (both v7x TensorCores busy),
    # each step gathers its S rows with concurrent DMAs and does dense stores.
    hidden, last_hidden = encoder_bert_forward(seq, table, b_block=1)
    jax.block_until_ready((hidden, last_hidden))

    # Pure-JAX reference check.
    ref_hidden = table[seq]                               # (B, S, E)
    ref_last = ref_hidden.mean(axis=1)                    # (B, E)
    assert np.allclose(np.asarray(hidden), np.asarray(ref_hidden), atol=1e-5)
    assert np.allclose(np.asarray(last_hidden), np.asarray(ref_last), atol=1e-5)

    print("KERNEL_OK")
</pallas_src>

<mosaic_0001>
module attributes {stable_mosaic.version = 11 : i64} {
  func.func @encoder_bert_kernel(%arg0: i32, %arg1: memref<16xi32, #tpu.memory_space<smem>>, %arg2: memref<96x512xf32, #tpu.memory_space<any>>, %arg3: memref<1x8x512xf32, #tpu.memory_space<vmem>>, %arg4: memref<1x1x512xf32, #tpu.memory_space<vmem>>, %arg5: memref<8x512xf32, #tpu.memory_space<vmem>>, %arg6: memref<8x!tpu.dma_semaphore, #tpu.memory_space<semaphore_mem>>) attributes {dimension_semantics = [#tpu.dimension_semantics<parallel>], iteration_bounds = array<i64: 2>, scalar_prefetch = 1 : i64, scratch_operands = 2 : i64, tpu.core_type = #tpu.core_type<tc>, window_params = [{}, {transform_indices = @transform_1, window_bounds = array<i64: 1, 8, 512>}, {transform_indices = @transform_2, window_bounds = array<i64: 1, 1, 512>}]} {
    %c8_i32 = arith.constant 8 : i32
    %0 = arith.muli %arg0, %c8_i32 : i32
    %c0_i32 = arith.constant 0 : i32
    %1 = arith.addi %0, %c0_i32 : i32
    %2 = arith.index_cast %1 : i32 to index
    %3 = memref.load %arg1[%2] : memref<16xi32, #tpu.memory_space<smem>>
    %c0_i32_0 = arith.constant 0 : i32
    %c0_i32_1 = arith.constant 0 : i32
    %4 = tpu.memref_slice %arg2[%3, %c0_i32_1] : memref<96x512xf32, #tpu.memory_space<any>> -> memref<1x512xf32, #tpu.memory_space<any>>
    %c0_i32_2 = arith.constant 0 : i32
    %c0_i32_3 = arith.constant 0 : i32
    %5 = tpu.memref_slice %arg5[%c0_i32_2, %c0_i32_3] : memref<8x512xf32, #tpu.memory_space<vmem>> -> memref<1x512xf32, #tpu.memory_space<vmem>>
    %6 = tpu.memref_slice %arg6[%c0_i32_0] : memref<8x!tpu.dma_semaphore, #tpu.memory_space<semaphore_mem>> -> memref<1x!tpu.dma_semaphore, #tpu.memory_space<semaphore_mem>>
    %7 = tpu.memref_squeeze %6 : memref<1x!tpu.dma_semaphore, #tpu.memory_space<semaphore_mem>> -> memref<!tpu.dma_semaphore, #tpu.memory_space<semaphore_mem>>
    tpu.enqueue_dma source(%4 : memref<1x512xf32, #tpu.memory_space<any>>) target(%5 : memref<1x512xf32, #tpu.memory_space<vmem>>) target_semaphore(%7 : memref<!tpu.dma_semaphore, #tpu.memory_space<semaphore_mem>>)
    %c1_i32 = arith.constant 1 : i32
    %8 = arith.addi %0, %c1_i32 : i32
    %9 = arith.index_cast %8 : i32 to index
    %10 = memref.load %arg1[%9] : memref<16xi32, #tpu.memory_space<smem>>
    %c1_i32_4 = arith.constant 1 : i32
    %c0_i32_5 = arith.constant 0 : i32
    %11 = tpu.memref_slice %arg2[%10, %c0_i32_5] : memref<96x512xf32, #tpu.memory_space<any>> -> memref<1x512xf32, #tpu.memory_space<any>>
    %c1_i32_6 = arith.constant 1 : i32
    %c0_i32_7 = arith.constant 0 : i32
    %12 = tpu.memref_slice %arg5[%c1_i32_6, %c0_i32_7] : memref<8x512xf32, #tpu.memory_space<vmem>> -> memref<1x512xf32, #tpu.memory_space<vmem>>
    %13 = tpu.memref_slice %arg6[%c1_i32_4] : memref<8x!tpu.dma_semaphore, #tpu.memory_space<semaphore_mem>> -> memref<1x!tpu.dma_semaphore, #tpu.memory_space<semaphore_mem>>
    %14 = tpu.memref_squeeze %13 : memref<1x!tpu.dma_semaphore, #tpu.memory_space<semaphore_mem>> -> memref<!tpu.dma_semaphore, #tpu.memory_space<semaphore_mem>>
    tpu.enqueue_dma source(%11 : memref<1x512xf32, #tpu.memory_space<any>>) target(%12 : memref<1x512xf32, #tpu.memory_space<vmem>>) target_semaphore(%14 : memref<!tpu.dma_semaphore, #tpu.memory_space<semaphore_mem>>)
    %c2_i32 = arith.constant 2 : i32
    %15 = arith.addi %0, %c2_i32 : i32
    %16 = arith.index_cast %15 : i32 to index
    %17 = memref.load %arg1[%16] : memref<16xi32, #tpu.memory_space<smem>>
    %c2_i32_8 = arith.constant 2 : i32
    %c0_i32_9 = arith.constant 0 : i32
    %18 = tpu.memref_slice %arg2[%17, %c0_i32_9] : memref<96x512xf32, #tpu.memory_space<any>> -> memref<1x512xf32, #tpu.memory_space<any>>
    %c2_i32_10 = arith.constant 2 : i32
    %c0_i32_11 = arith.constant 0 : i32
    %19 = tpu.memref_slice %arg5[%c2_i32_10, %c0_i32_11] : memref<8x512xf32, #tpu.memory_space<vmem>> -> memref<1x512xf32, #tpu.memory_space<vmem>>
    %20 = tpu.memref_slice %arg6[%c2_i32_8] : memref<8x!tpu.dma_semaphore, #tpu.memory_space<semaphore_mem>> -> memref<1x!tpu.dma_semaphore, #tpu.memory_space<semaphore_mem>>
    %21 = tpu.memref_squeeze %20 : memref<1x!tpu.dma_semaphore, #tpu.memory_space<semaphore_mem>> -> memref<!tpu.dma_semaphore, #tpu.memory_space<semaphore_mem>>
    tpu.enqueue_dma source(%18 : memref<1x512xf32, #tpu.memory_space<any>>) target(%19 : memref<1x512xf32, #tpu.memory_space<vmem>>) target_semaphore(%21 : memref<!tpu.dma_semaphore, #tpu.memory_space<semaphore_mem>>)
    %c3_i32 = arith.constant 3 : i32
    %22 = arith.addi %0, %c3_i32 : i32
    %23 = arith.index_cast %22 : i32 to index
    %24 = memref.load %arg1[%23] : memref<16xi32, #tpu.memory_space<smem>>
    %c3_i32_12 = arith.constant 3 : i32
    %c0_i32_13 = arith.constant 0 : i32
    %25 = tpu.memref_slice %arg2[%24, %c0_i32_13] : memref<96x512xf32, #tpu.memory_space<any>> -> memref<1x512xf32, #tpu.memory_space<any>>
    %c3_i32_14 = arith.constant 3 : i32
    %c0_i32_15 = arith.constant 0 : i32
    %26 = tpu.memref_slice %arg5[%c3_i32_14, %c0_i32_15] : memref<8x512xf32, #tpu.memory_space<vmem>> -> memref<1x512xf32, #tpu.memory_space<vmem>>
    %27 = tpu.memref_slice %arg6[%c3_i32_12] : memref<8x!tpu.dma_semaphore, #tpu.memory_space<semaphore_mem>> -> memref<1x!tpu.dma_semaphore, #tpu.memory_space<semaphore_mem>>
    %28 = tpu.memref_squeeze %27 : memref<1x!tpu.dma_semaphore, #tpu.memory_space<semaphore_mem>> -> memref<!tpu.dma_semaphore, #tpu.memory_space<semaphore_mem>>
    tpu.enqueue_dma source(%25 : memref<1x512xf32, #tpu.memory_space<any>>) target(%26 : memref<1x512xf32, #tpu.memory_space<vmem>>) target_semaphore(%28 : memref<!tpu.dma_semaphore, #tpu.memory_space<semaphore_mem>>)
    %c4_i32 = arith.constant 4 : i32
    %29 = arith.addi %0, %c4_i32 : i32
    %30 = arith.index_cast %29 : i32 to index
    %31 = memref.load %arg1[%30] : memref<16xi32, #tpu.memory_space<smem>>
    %c4_i32_16 = arith.constant 4 : i32
    %c0_i32_17 = arith.constant 0 : i32
    %32 = tpu.memref_slice %arg2[%31, %c0_i32_17] : memref<96x512xf32, #tpu.memory_space<any>> -> memref<1x512xf32, #tpu.memory_space<any>>
    %c4_i32_18 = arith.constant 4 : i32
    %c0_i32_19 = arith.constant 0 : i32
    %33 = tpu.memref_slice %arg5[%c4_i32_18, %c0_i32_19] : memref<8x512xf32, #tpu.memory_space<vmem>> -> memref<1x512xf32, #tpu.memory_space<vmem>>
    %34 = tpu.memref_slice %arg6[%c4_i32_16] : memref<8x!tpu.dma_semaphore, #tpu.memory_space<semaphore_mem>> -> memref<1x!tpu.dma_semaphore, #tpu.memory_space<semaphore_mem>>
    %35 = tpu.memref_squeeze %34 : memref<1x!tpu.dma_semaphore, #tpu.memory_space<semaphore_mem>> -> memref<!tpu.dma_semaphore, #tpu.memory_space<semaphore_mem>>
    tpu.enqueue_dma source(%32 : memref<1x512xf32, #tpu.memory_space<any>>) target(%33 : memref<1x512xf32, #tpu.memory_space<vmem>>) target_semaphore(%35 : memref<!tpu.dma_semaphore, #tpu.memory_space<semaphore_mem>>)
    %c5_i32 = arith.constant 5 : i32
    %36 = arith.addi %0, %c5_i32 : i32
    %37 = arith.index_cast %36 : i32 to index
    %38 = memref.load %arg1[%37] : memref<16xi32, #tpu.memory_space<smem>>
    %c5_i32_20 = arith.constant 5 : i32
    %c0_i32_21 = arith.constant 0 : i32
    %39 = tpu.memref_slice %arg2[%38, %c0_i32_21] : memref<96x512xf32, #tpu.memory_space<any>> -> memref<1x512xf32, #tpu.memory_space<any>>
    %c5_i32_22 = arith.constant 5 : i32
    %c0_i32_23 = arith.constant 0 : i32
    %40 = tpu.memref_slice %arg5[%c5_i32_22, %c0_i32_23] : memref<8x512xf32, #tpu.memory_space<vmem>> -> memref<1x512xf32, #tpu.memory_space<vmem>>
    %41 = tpu.memref_slice %arg6[%c5_i32_20] : memref<8x!tpu.dma_semaphore, #tpu.memory_space<semaphore_mem>> -> memref<1x!tpu.dma_semaphore, #tpu.memory_space<semaphore_mem>>
    %42 = tpu.memref_squeeze %41 : memref<1x!tpu.dma_semaphore, #tpu.memory_space<semaphore_mem>> -> memref<!tpu.dma_semaphore, #tpu.memory_space<semaphore_mem>>
    tpu.enqueue_dma source(%39 : memref<1x512xf32, #tpu.memory_space<any>>) target(%40 : memref<1x512xf32, #tpu.memory_space<vmem>>) target_semaphore(%42 : memref<!tpu.dma_semaphore, #tpu.memory_space<semaphore_mem>>)
    %c6_i32 = arith.constant 6 : i32
    %43 = arith.addi %0, %c6_i32 : i32
    %44 = arith.index_cast %43 : i32 to index
    %45 = memref.load %arg1[%44] : memref<16xi32, #tpu.memory_space<smem>>
    %c6_i32_24 = arith.constant 6 : i32
    %c0_i32_25 = arith.constant 0 : i32
    %46 = tpu.memref_slice %arg2[%45, %c0_i32_25] : memref<96x512xf32, #tpu.memory_space<any>> -> memref<1x512xf32, #tpu.memory_space<any>>
    %c6_i32_26 = arith.constant 6 : i32
    %c0_i32_27 = arith.constant 0 : i32
    %47 = tpu.memref_slice %arg5[%c6_i32_26, %c0_i32_27] : memref<8x512xf32, #tpu.memory_space<vmem>> -> memref<1x512xf32, #tpu.memory_space<vmem>>
    %48 = tpu.memref_slice %arg6[%c6_i32_24] : memref<8x!tpu.dma_semaphore, #tpu.memory_space<semaphore_mem>> -> memref<1x!tpu.dma_semaphore, #tpu.memory_space<semaphore_mem>>
    %49 = tpu.memref_squeeze %48 : memref<1x!tpu.dma_semaphore, #tpu.memory_space<semaphore_mem>> -> memref<!tpu.dma_semaphore, #tpu.memory_space<semaphore_mem>>
    tpu.enqueue_dma source(%46 : memref<1x512xf32, #tpu.memory_space<any>>) target(%47 : memref<1x512xf32, #tpu.memory_space<vmem>>) target_semaphore(%49 : memref<!tpu.dma_semaphore, #tpu.memory_space<semaphore_mem>>)
    %c7_i32 = arith.constant 7 : i32
    %50 = arith.addi %0, %c7_i32 : i32
    %51 = arith.index_cast %50 : i32 to index
    %52 = memref.load %arg1[%51] : memref<16xi32, #tpu.memory_space<smem>>
    %c7_i32_28 = arith.constant 7 : i32
    %c0_i32_29 = arith.constant 0 : i32
    %53 = tpu.memref_slice %arg2[%52, %c0_i32_29] : memref<96x512xf32, #tpu.memory_space<any>> -> memref<1x512xf32, #tpu.memory_space<any>>
    %c7_i32_30 = arith.constant 7 : i32
    %c0_i32_31 = arith.constant 0 : i32
    %54 = tpu.memref_slice %arg5[%c7_i32_30, %c0_i32_31] : memref<8x512xf32, #tpu.memory_space<vmem>> -> memref<1x512xf32, #tpu.memory_space<vmem>>
    %55 = tpu.memref_slice %arg6[%c7_i32_28] : memref<8x!tpu.dma_semaphore, #tpu.memory_space<semaphore_mem>> -> memref<1x!tpu.dma_semaphore, #tpu.memory_space<semaphore_mem>>
    %56 = tpu.memref_squeeze %55 : memref<1x!tpu.dma_semaphore, #tpu.memory_space<semaphore_mem>> -> memref<!tpu.dma_semaphore, #tpu.memory_space<semaphore_mem>>
    tpu.enqueue_dma source(%53 : memref<1x512xf32, #tpu.memory_space<any>>) target(%54 : memref<1x512xf32, #tpu.memory_space<vmem>>) target_semaphore(%56 : memref<!tpu.dma_semaphore, #tpu.memory_space<semaphore_mem>>)
    %c0_i32_32 = arith.constant 0 : i32
    %c0_i32_33 = arith.constant 0 : i32
    %c0_i32_34 = arith.constant 0 : i32
    %57 = tpu.memref_slice %arg2[%c0_i32_33, %c0_i32_34] : memref<96x512xf32, #tpu.memory_space<any>> -> memref<1x512xf32, #tpu.memory_space<any>>
    %c0_i32_35 = arith.constant 0 : i32
    %c0_i32_36 = arith.constant 0 : i32
    %58 = tpu.memref_slice %arg5[%c0_i32_35, %c0_i32_36] : memref<8x512xf32, #tpu.memory_space<vmem>> -> memref<1x512xf32, #tpu.memory_space<vmem>>
    %59 = tpu.memref_slice %arg6[%c0_i32_32] : memref<8x!tpu.dma_semaphore, #tpu.memory_space<semaphore_mem>> -> memref<1x!tpu.dma_semaphore, #tpu.memory_space<semaphore_mem>>
    %60 = tpu.memref_squeeze %59 : memref<1x!tpu.dma_semaphore, #tpu.memory_space<semaphore_mem>> -> memref<!tpu.dma_semaphore, #tpu.memory_space<semaphore_mem>>
    tpu.wait_dma2 semaphore(%60 : memref<!tpu.dma_semaphore, #tpu.memory_space<semaphore_mem>>) src(%57 : memref<1x512xf32, #tpu.memory_space<any>>) dst(%58 : memref<1x512xf32, #tpu.memory_space<vmem>>)
    %c1_i32_37 = arith.constant 1 : i32
    %c0_i32_38 = arith.constant 0 : i32
    %c0_i32_39 = arith.constant 0 : i32
    %61 = tpu.memref_slice %arg2[%c0_i32_38, %c0_i32_39] : memref<96x512xf32, #tpu.memory_space<any>> -> memref<1x512xf32, #tpu.memory_space<any>>
    %c1_i32_40 = arith.constant 1 : i32
    %c0_i32_41 = arith.constant 0 : i32
    %62 = tpu.memref_slice %arg5[%c1_i32_40, %c0_i32_41] : memref<8x512xf32, #tpu.memory_space<vmem>> -> memref<1x512xf32, #tpu.memory_space<vmem>>
    %63 = tpu.memref_slice %arg6[%c1_i32_37] : memref<8x!tpu.dma_semaphore, #tpu.memory_space<semaphore_mem>> -> memref<1x!tpu.dma_semaphore, #tpu.memory_space<semaphore_mem>>
    %64 = tpu.memref_squeeze %63 : memref<1x!tpu.dma_semaphore, #tpu.memory_space<semaphore_mem>> -> memref<!tpu.dma_semaphore, #tpu.memory_space<semaphore_mem>>
    tpu.wait_dma2 semaphore(%64 : memref<!tpu.dma_semaphore, #tpu.memory_space<semaphore_mem>>) src(%61 : memref<1x512xf32, #tpu.memory_space<any>>) dst(%62 : memref<1x512xf32, #tpu.memory_space<vmem>>)
    %c2_i32_42 = arith.constant 2 : i32
    %c0_i32_43 = arith.constant 0 : i32
    %c0_i32_44 = arith.constant 0 : i32
    %65 = tpu.memref_slice %arg2[%c0_i32_43, %c0_i32_44] : memref<96x512xf32, #tpu.memory_space<any>> -> memref<1x512xf32, #tpu.memory_space<any>>
    %c2_i32_45 = arith.constant 2 : i32
    %c0_i32_46 = arith.constant 0 : i32
    %66 = tpu.memref_slice %arg5[%c2_i32_45, %c0_i32_46] : memref<8x512xf32, #tpu.memory_space<vmem>> -> memref<1x512xf32, #tpu.memory_space<vmem>>
    %67 = tpu.memref_slice %arg6[%c2_i32_42] : memref<8x!tpu.dma_semaphore, #tpu.memory_space<semaphore_mem>> -> memref<1x!tpu.dma_semaphore, #tpu.memory_space<semaphore_mem>>
    %68 = tpu.memref_squeeze %67 : memref<1x!tpu.dma_semaphore, #tpu.memory_space<semaphore_mem>> -> memref<!tpu.dma_semaphore, #tpu.memory_space<semaphore_mem>>
    tpu.wait_dma2 semaphore(%68 : memref<!tpu.dma_semaphore, #tpu.memory_space<semaphore_mem>>) src(%65 : memref<1x512xf32, #tpu.memory_space<any>>) dst(%66 : memref<1x512xf32, #tpu.memory_space<vmem>>)
    %c3_i32_47 = arith.constant 3 : i32
    %c0_i32_48 = arith.constant 0 : i32
    %c0_i32_49 = arith.constant 0 : i32
    %69 = tpu.memref_slice %arg2[%c0_i32_48, %c0_i32_49] : memref<96x512xf32, #tpu.memory_space<any>> -> memref<1x512xf32, #tpu.memory_space<any>>
    %c3_i32_50 = arith.constant 3 : i32
    %c0_i32_51 = arith.constant 0 : i32
    %70 = tpu.memref_slice %arg5[%c3_i32_50, %c0_i32_51] : memref<8x512xf32, #tpu.memory_space<vmem>> -> memref<1x512xf32, #tpu.memory_space<vmem>>
    %71 = tpu.memref_slice %arg6[%c3_i32_47] : memref<8x!tpu.dma_semaphore, #tpu.memory_space<semaphore_mem>> -> memref<1x!tpu.dma_semaphore, #tpu.memory_space<semaphore_mem>>
    %72 = tpu.memref_squeeze %71 : memref<1x!tpu.dma_semaphore, #tpu.memory_space<semaphore_mem>> -> memref<!tpu.dma_semaphore, #tpu.memory_space<semaphore_mem>>
    tpu.wait_dma2 semaphore(%72 : memref<!tpu.dma_semaphore, #tpu.memory_space<semaphore_mem>>) src(%69 : memref<1x512xf32, #tpu.memory_space<any>>) dst(%70 : memref<1x512xf32, #tpu.memory_space<vmem>>)
    %c4_i32_52 = arith.constant 4 : i32
    %c0_i32_53 = arith.constant 0 : i32
    %c0_i32_54 = arith.constant 0 : i32
    %73 = tpu.memref_slice %arg2[%c0_i32_53, %c0_i32_54] : memref<96x512xf32, #tpu.memory_space<any>> -> memref<1x512xf32, #tpu.memory_space<any>>
    %c4_i32_55 = arith.constant 4 : i32
    %c0_i32_56 = arith.constant 0 : i32
    %74 = tpu.memref_slice %arg5[%c4_i32_55, %c0_i32_56] : memref<8x512xf32, #tpu.memory_space<vmem>> -> memref<1x512xf32, #tpu.memory_space<vmem>>
    %75 = tpu.memref_slice %arg6[%c4_i32_52] : memref<8x!tpu.dma_semaphore, #tpu.memory_space<semaphore_mem>> -> memref<1x!tpu.dma_semaphore, #tpu.memory_space<semaphore_mem>>
    %76 = tpu.memref_squeeze %75 : memref<1x!tpu.dma_semaphore, #tpu.memory_space<semaphore_mem>> -> memref<!tpu.dma_semaphore, #tpu.memory_space<semaphore_mem>>
    tpu.wait_dma2 semaphore(%76 : memref<!tpu.dma_semaphore, #tpu.memory_space<semaphore_mem>>) src(%73 : memref<1x512xf32, #tpu.memory_space<any>>) dst(%74 : memref<1x512xf32, #tpu.memory_space<vmem>>)
    %c5_i32_57 = arith.constant 5 : i32
    %c0_i32_58 = arith.constant 0 : i32
    %c0_i32_59 = arith.constant 0 : i32
    %77 = tpu.memref_slice %arg2[%c0_i32_58, %c0_i32_59] : memref<96x512xf32, #tpu.memory_space<any>> -> memref<1x512xf32, #tpu.memory_space<any>>
    %c5_i32_60 = arith.constant 5 : i32
    %c0_i32_61 = arith.constant 0 : i32
    %78 = tpu.memref_slice %arg5[%c5_i32_60, %c0_i32_61] : memref<8x512xf32, #tpu.memory_space<vmem>> -> memref<1x512xf32, #tpu.memory_space<vmem>>
    %79 = tpu.memref_slice %arg6[%c5_i32_57] : memref<8x!tpu.dma_semaphore, #tpu.memory_space<semaphore_mem>> -> memref<1x!tpu.dma_semaphore, #tpu.memory_space<semaphore_mem>>
    %80 = tpu.memref_squeeze %79 : memref<1x!tpu.dma_semaphore, #tpu.memory_space<semaphore_mem>> -> memref<!tpu.dma_semaphore, #tpu.memory_space<semaphore_mem>>
    tpu.wait_dma2 semaphore(%80 : memref<!tpu.dma_semaphore, #tpu.memory_space<semaphore_mem>>) src(%77 : memref<1x512xf32, #tpu.memory_space<any>>) dst(%78 : memref<1x512xf32, #tpu.memory_space<vmem>>)
    %c6_i32_62 = arith.constant 6 : i32
    %c0_i32_63 = arith.constant 0 : i32
    %c0_i32_64 = arith.constant 0 : i32
    %81 = tpu.memref_slice %arg2[%c0_i32_63, %c0_i32_64] : memref<96x512xf32, #tpu.memory_space<any>> -> memref<1x512xf32, #tpu.memory_space<any>>
    %c6_i32_65 = arith.constant 6 : i32
    %c0_i32_66 = arith.constant 0 : i32
    %82 = tpu.memref_slice %arg5[%c6_i32_65, %c0_i32_66] : memref<8x512xf32, #tpu.memory_space<vmem>> -> memref<1x512xf32, #tpu.memory_space<vmem>>
    %83 = tpu.memref_slice %arg6[%c6_i32_62] : memref<8x!tpu.dma_semaphore, #tpu.memory_space<semaphore_mem>> -> memref<1x!tpu.dma_semaphore, #tpu.memory_space<semaphore_mem>>
    %84 = tpu.memref_squeeze %83 : memref<1x!tpu.dma_semaphore, #tpu.memory_space<semaphore_mem>> -> memref<!tpu.dma_semaphore, #tpu.memory_space<semaphore_mem>>
    tpu.wait_dma2 semaphore(%84 : memref<!tpu.dma_semaphore, #tpu.memory_space<semaphore_mem>>) src(%81 : memref<1x512xf32, #tpu.memory_space<any>>) dst(%82 : memref<1x512xf32, #tpu.memory_space<vmem>>)
    %c7_i32_67 = arith.constant 7 : i32
    %c0_i32_68 = arith.constant 0 : i32
    %c0_i32_69 = arith.constant 0 : i32
    %85 = tpu.memref_slice %arg2[%c0_i32_68, %c0_i32_69] : memref<96x512xf32, #tpu.memory_space<any>> -> memref<1x512xf32, #tpu.memory_space<any>>
    %c7_i32_70 = arith.constant 7 : i32
    %c0_i32_71 = arith.constant 0 : i32
    %86 = tpu.memref_slice %arg5[%c7_i32_70, %c0_i32_71] : memref<8x512xf32, #tpu.memory_space<vmem>> -> memref<1x512xf32, #tpu.memory_space<vmem>>
    %87 = tpu.memref_slice %arg6[%c7_i32_67] : memref<8x!tpu.dma_semaphore, #tpu.memory_space<semaphore_mem>> -> memref<1x!tpu.dma_semaphore, #tpu.memory_space<semaphore_mem>>
    %88 = tpu.memref_squeeze %87 : memref<1x!tpu.dma_semaphore, #tpu.memory_space<semaphore_mem>> -> memref<!tpu.dma_semaphore, #tpu.memory_space<semaphore_mem>>
    tpu.wait_dma2 semaphore(%88 : memref<!tpu.dma_semaphore, #tpu.memory_space<semaphore_mem>>) src(%85 : memref<1x512xf32, #tpu.memory_space<any>>) dst(%86 : memref<1x512xf32, #tpu.memory_space<vmem>>)
    %c0 = arith.constant 0 : index
    %c0_72 = arith.constant 0 : index
    %89 = vector.load %arg5[%c0, %c0_72] : memref<8x512xf32, #tpu.memory_space<vmem>>, vector<8x512xf32>
    %90 = vector.shape_cast %89 : vector<8x512xf32> to vector<1x8x512xf32>
    %c0_73 = arith.constant 0 : index
    %c0_74 = arith.constant 0 : index
    %c0_75 = arith.constant 0 : index
    %91 = vector.load %arg3[%c0_73, %c0_74, %c0_75] : memref<1x8x512xf32, #tpu.memory_space<vmem>>, vector<1x8x512xf32>
    tpu.vector_store %arg3[%c0_73, %c0_74, %c0_75], %90 {strides = array<i32>} : memref<1x8x512xf32, #tpu.memory_space<vmem>>, vector<1x8x512xf32>,
    %92 = vector.shape_cast %89 : vector<8x512xf32> to vector<1x8x512xf32>
    %cst = arith.constant dense<0.000000e+00> : vector<1x512xf32>
    %93 = vector.multi_reduction <add>, %92, %cst [1] : vector<1x8x512xf32> to vector<1x512xf32>
    %94 = vector.shape_cast %93 : vector<1x512xf32> to vector<1x1x512xf32>
    %cst_76 = arith.constant 8.000000e+00 : f32
    %95 = vector.broadcast %cst_76 : f32 to vector<1x1x512xf32>
    %96 = arith.divf %94, %95 : vector<1x1x512xf32>
    %c0_77 = arith.constant 0 : index
    %c0_78 = arith.constant 0 : index
    %c0_79 = arith.constant 0 : index
    %97 = vector.load %arg4[%c0_77, %c0_78, %c0_79] : memref<1x1x512xf32, #tpu.memory_space<vmem>>, vector<1x1x512xf32>
    tpu.vector_store %arg4[%c0_77, %c0_78, %c0_79], %96 {strides = array<i32>} : memref<1x1x512xf32, #tpu.memory_space<vmem>>, vector<1x1x512xf32>,
    return
  }
  func.func @transform_1(%arg0: i32, %arg1: memref<16xi32, #tpu.memory_space<smem>>) -> (i32, i32, i32) {
    %c0_i32 = arith.constant 0 : i32
    %c0_i32_0 = arith.constant 0 : i32
    %c0_i32_1 = arith.constant 0 : i32
    return %arg0, %c0_i32, %c0_i32_0 : i32, i32, i32
  }
  func.func @transform_2(%arg0: i32, %arg1: memref<16xi32, #tpu.memory_space<smem>>) -> (i32, i32, i32) {
    %c0_i32 = arith.constant 0 : i32
    %c0_i32_0 = arith.constant 0 : i32
    %c0_i32_1 = arith.constant 0 : i32
    return %arg0, %c0_i32, %c0_i32_0 : i32, i32, i32
  }
}

</mosaic_0001>

<bundles_post_ra>
// kernel: tpu_custom_call.1
= control target key start
LH: loop header
LB: loop body
LE: loop exit
PB: predicated region body
PF: predicated region fallthrough
CT: control target
= control target key end

     0   :  { %s1222_s0 = inlined_call_operand.hbm [shape: s32[16], index: 0, kind: input, shape index: {}]   ;;  %s1223_s1 = inlined_call_operand.hbm [shape: f32[96,512], index: 1, kind: input, shape index: {}]   ;;  %s1224_s2 = inlined_call_operand.hbm [shape: f32[2,8,512], index: 2, kind: output, shape index: {0}]   ;;  %s1225_s3 = inlined_call_operand.hbm [shape: f32[2,1,512], index: 3, kind: output, shape index: {1}]  }
   0x1   :  { %s571_s14 = scalar_lea.hbm %s1222_s0, 16 }
   0x2   :  { %p572_p0 = scmp.ne.s32.totalorder %s1222_s0, %s571_s14  ;;  %p575_p1 = scmp.lt.u32.totalorder %s571_s14, %s1222_s0 }
   0x4   :  { %p577_p2 = pnand %p575_p1, %p572_p0 }
   0x6   :  { %580 = shalt.err (!%p577_p2)  }
   0x7   :  { %s879_s19 = smov [#allocation5]  }
   0x8   :  { %10 = dma.hbm_to_smem %s1222_s0, 16, %s879_s19, [#allocation4] }
   0x9   :  { %841 = dma.done.wait [#allocation4], 16 }
   0xa   :  { %842 = vsyncadd [#allocation4], 4294967280 }
   0xb   :  { %12 = sfence }
   0xc   :  { %13 = vsyncpa [#allocation7], 0 }
   0xd   :  { %15 = vsyncpa [#allocation7 + $0x1], 0 }
   0xe   :  { %16 = vsyncpa [#allocation9], 0 }
   0xf   :  { %18 = vsyncpa [#allocation9 + $0x1], 0  ;;  %s925_s22 = smov 0   ;;  %s927_s23 = smov 0  }
  0x10   :  { %s929_s24 = smov 0  }
  0x11 LB: > { %1231 = sst [smem:[#allocation29_spill]] %s869_s22  ;;  %s482_s0 = sadd.s32 4294967295, %s877_s24   ;;  %s877_s24 = sphi %s929_s24, %s1242_s24   ;;  %s873_s23 = sphi %s927_s23, %s1244_s23   ;;  %s869_s22 = sphi %s925_s22, %s1243_s22  }
  0x12   : > { %1232 = sst [smem:[#allocation30_spill]] %s873_s23  ;;  %s942_s25 = sadd.s32 1, %s877_s24  }
  0x13   : > { %1233 = sst [smem:[#allocation31_spill]] %s942_s25  ;;  %s27_s26 = ssub.s32 %s877_s24, %s942_s25 }
  0x14   : > { %s30_s27 = sadd.s32 1, %s873_s23  ;;  %p28_p3 = scmp.eq.s32.totalorder %s27_s26, 0 }
  0x15   : > { %p483_p4 = scmp.ne.s32.totalorder %s27_s26, 0  ;;  %p34_p5 = scmp.eq.s32.totalorder %s877_s24, 1 }
  0x16   : > { %p39_p6 = scmp.ne.s32.totalorder %s873_s23, %s869_s22  ;;  %p40_p8 = scmp.eq.s32.totalorder %s482_s0, 1 }
  0x17   : > { %s951_s28 = scalar_select %p28_p3, %s873_s23, %s30_s27  }
  0x18   : > { %p953_p7 = por %p483_p4, %p34_p5  ;;  %p957_p9 = por %p40_p8, %p39_p6 }
  0x19   : > { %1234 = sst [smem:[#allocation32_spill]] %s951_s28  ;;  %p485_p10 = scmp.ge.s32.totalorder %s877_s24, 2 }
  0x1a   : > { %s1236_s30 = scalar_select %p957_p9, 1, 0 }
  0x1b   : > { %68 = sbr.rel (%p485_p10) target bundleno = 304 (0x130), region = 12  ;;  %s963_s4 = sand.u32 (!%p485_p10), 1, %s873_s23  }
  0x1c   : > { %1237 = sst [smem:[#allocation33_spill]] %s1236_s30  ;;  %s966_s5 = sshll.u32 (!%p485_p10), %s877_s24, 3 }
  0x1d   : > { %s84_s8 = sld [smem:[#allocation5 + %s966_s5]] (!%p485_p10)  ;;  %s880_s9 = smov (!%p485_p10), [#allocation2]  }
  0x1e   : > { %s92_s10 = sshll.u32 (!%p485_p10), %s880_s9, 4  ;;  %s96_s11 = sadd.s32 (!%p485_p10), 1, %s966_s5  ;;  %s971_s10 = int_to_ptr.vmem [resolvable:$true] %s92_s10 }
  0x1f   : > { %s974_s12 = sld [smem:[#allocation5 + %s96_s11]] (!%p485_p10)  ;;  %s881_s13 = smov (!%p485_p10), [#allocation2 + $0x1]  }
  0x20   : > { %s107_s14 = sshll.u32 (!%p485_p10), %s881_s13, 4  ;;  %s111_s15 = sadd.s32 (!%p485_p10), 2, %s966_s5  ;;  %s976_s14 = int_to_ptr.vmem [resolvable:$true] %s107_s14 }
  0x21   : > { %s979_s19 = sld [smem:[#allocation5 + %s111_s15]] (!%p485_p10)  ;;  %s882_s0 = smov (!%p485_p10), [#allocation2 + $0x2]  }
  0x22   : > { %s981_s26 = sshll.u32 %s882_s0, 4  ;;  %s990_s23 = scalar_lea.hbm %s1223_s1, 6144  ;;  %s123_s26 = int_to_ptr.vmem [resolvable:$true] %s981_s26 }
  0x23   : > { %s85_s16 = sshrl.u32 %s84_s8, 3  ;;  %s86_s17 = sand.u32 7, %s84_s8  }
  0x24   : > { %s489_s18 = sshll.u32 %s85_s16, 5 }
  0x25   : > { %s88_s20 = sadd.s32 %s489_s18, %s86_s17  ;;  %s98_s7 = sshrl.u32 %s974_s12, 3 }
  0x26   : > { %s490_s21 = sshll.u32 %s88_s20, 4 }
  0x27   : > { %s90_s11 = scalar_lea.hbm %s1223_s1, %s490_s21 }
  0x28   : > { %s581_s6 = scalar_lea.hbm %s90_s11, 64  ;;  %p584_p12 = scmp.lt.u32.totalorder %s90_s11, %s1223_s1 }
  0x29   : > { %p582_p11 = scmp.ne.s32.totalorder %s90_s11, %s581_s6  ;;  %p585_p13 = scmp.lt.u32.totalorder %s990_s23, %s581_s6 }
  0x2a   : > { %p587_p1 = scmp.lt.u32.totalorder %s581_s6, %s90_s11 }
  0x2b   : > { %p586_p0 = por %p585_p13, %p584_p12 }
  0x2d   : > { %p588_p2 = por %p587_p1, %p586_p0 }
  0x2f   : > { %p589_p3 = pnand %p588_p2, %p582_p11 }
  0x31   : > { %592 = shalt.err (!%p589_p3)  }
  0x32   : > { %s593_s16 = scalar_lea.vmem %s971_s10, 64  ;;  %s999_s28 = scalar_lea.vmem %s971_s10, 512 }
  0x33   : > { %p594_p4 = scmp.ne.s32.totalorder %s971_s10, %s593_s16  ;;  %p598_p5 = scmp.lt.s32.totalorder %s971_s10, %s971_s10 }
  0x34   : > { %p599_p6 = scmp.lt.s32.totalorder %s999_s28, %s593_s16 }
  0x36   : > { %p600_p8 = por %p599_p6, %p598_p5 }
  0x38   : > { %p601_p10 = pnand %p600_p8, %p594_p4 }
  0x3a   : > { %604 = shalt.err (!%p601_p10)  }
  0x3b   : > { %s883_s17 = smov 128   ;;  %s884_s6 = smov 1  }
  0x3c   : > { %95 = dma.hbm_to_vmem [thread:$0]  %s90_s11, 64, %s971_s10, [#allocation3], %s883_s17, %s883_s17, %s884_s6 }
  0x3d   : > { %s99_s18 = sand.u32 7, %s974_s12   ;;  %s491_s20 = sshll.u32 %s98_s7, 5 }
  0x3e   : > { %s101_s21 = sadd.s32 %s491_s20, %s99_s18  ;;  %s113_s0 = sshrl.u32 %s979_s19, 3 }
  0x3f   : > { %s492_s27 = sshll.u32 %s101_s21, 4  ;;  %s114_s9 = sand.u32 7, %s979_s19  }
  0x40   : > { %s103_s15 = scalar_lea.hbm %s1223_s1, %s492_s27  ;;  %s493_s16 = sshll.u32 %s113_s0, 5 }
  0x41   : > { %s605_s25 = scalar_lea.hbm %s103_s15, 64  ;;  %p608_p12 = scmp.lt.u32.totalorder %s103_s15, %s1223_s1 }
  0x42   : > { %p606_p11 = scmp.ne.s32.totalorder %s103_s15, %s605_s25  ;;  %p609_p13 = scmp.lt.u32.totalorder %s990_s23, %s605_s25 }
  0x43   : > { %p611_p1 = scmp.lt.u32.totalorder %s605_s25, %s103_s15 }
  0x44   : > { %p610_p0 = por %p609_p13, %p608_p12 }
  0x46   : > { %p612_p2 = por %p611_p1, %p610_p0 }
  0x48   : > { %p613_p3 = pnand %p612_p2, %p606_p11 }
  0x4a   : > { %616 = shalt.err (!%p613_p3)  }
  0x4b   : > { %s617_s7 = scalar_lea.vmem %s976_s14, 64  ;;  %p622_p5 = scmp.lt.s32.totalorder %s976_s14, %s971_s10 }
  0x4c   : > { %p618_p4 = scmp.ne.s32.totalorder %s976_s14, %s617_s7  ;;  %p623_p6 = scmp.lt.s32.totalorder %s999_s28, %s617_s7 }
  0x4e   : > { %p624_p8 = por %p623_p6, %p622_p5 }
  0x50   : > { %p625_p10 = pnand %p624_p8, %p618_p4 }
  0x52   : > { %628 = shalt.err (!%p625_p10)  }
  0x53   : > { %110 = dma.hbm_to_vmem [thread:$0]  %s103_s15, 64, %s976_s14, [#allocation3 + $0x1], %s883_s17, %s883_s17, %s884_s6 }
  0x54   : > { %s116_s22 = sadd.s32 %s493_s16, %s114_s9  ;;  %s126_s30 = sadd.s32 3, %s966_s5 }
  0x55   : > { %s494_s25 = sshll.u32 %s116_s22, 4  ;;  %s1032_s18 = sld [smem:[#allocation5 + %s126_s30]] }
  0x56   : > { %s118_s11 = scalar_lea.hbm %s1223_s1, %s494_s25 }
  0x57   : > { %s629_s20 = scalar_lea.hbm %s118_s11, 64  ;;  %p632_p12 = scmp.lt.u32.totalorder %s118_s11, %s1223_s1 }
  0x58   : > { %p630_p11 = scmp.ne.s32.totalorder %s118_s11, %s629_s20  ;;  %p633_p13 = scmp.lt.u32.totalorder %s990_s23, %s629_s20 }
  0x59   : > { %p635_p1 = scmp.lt.u32.totalorder %s629_s20, %s118_s11 }
  0x5a   : > { %p634_p0 = por %p633_p13, %p632_p12 }
  0x5c   : > { %p636_p2 = por %p635_p1, %p634_p0 }
  0x5e   : > { %p637_p3 = pnand %p636_p2, %p630_p11 }
  0x60   : > { %640 = shalt.err (!%p637_p3)  }
  0x61   : > { %s641_s14 = scalar_lea.vmem %s123_s26, 64  ;;  %p646_p5 = scmp.lt.s32.totalorder %s123_s26, %s971_s10 }
  0x62   : > { %p642_p4 = scmp.ne.s32.totalorder %s123_s26, %s641_s14  ;;  %p647_p6 = scmp.lt.s32.totalorder %s999_s28, %s641_s14 }
  0x64   : > { %p648_p8 = por %p647_p6, %p646_p5 }
  0x66   : > { %p649_p10 = pnand %p648_p8, %p642_p4 }
  0x68   : > { %652 = shalt.err (!%p649_p10)  }
  0x69   : > { %125 = dma.hbm_to_vmem [thread:$0]  %s118_s11, 64, %s123_s26, [#allocation3 + $0x2], %s883_s17, %s883_s17, %s884_s6 }
  0x6a   : > { %s141_s27 = sadd.s32 4, %s966_s5  ;;  %s885_s9 = smov [#allocation2 + $0x3]  }
  0x6b   : > { %s137_s13 = sshll.u32 %s885_s9, 4  ;;  %s1044_s8 = sld [smem:[#allocation5 + %s141_s27]]  ;;  %s1046_s13 = int_to_ptr.vmem [resolvable:$true] %s137_s13 }
  0x6c   : > { %s886_s15 = smov [#allocation2 + $0x4]   ;;  %s156_s7 = sadd.s32 5, %s966_s5 }
  0x6d   : > { %s152_s16 = sshll.u32 %s886_s15, 4  ;;  %s128_s22 = sshrl.u32 %s1032_s18, 3  ;;  %s1051_s16 = int_to_ptr.vmem [resolvable:$true] %s152_s16 }
  0x6e   : > { %s129_s25 = sand.u32 7, %s1032_s18   ;;  %s495_s30 = sshll.u32 %s128_s22, 5 }
  0x6f   : > { %s131_s12 = sadd.s32 %s495_s30, %s129_s25  ;;  %s1053_s26 = sld [smem:[#allocation5 + %s156_s7]] }
  0x70   : > { %s496_s19 = sshll.u32 %s131_s12, 4 }
  0x71   : > { %s143_s11 = sshrl.u32 %s1044_s8, 3  ;;  %s133_s0 = scalar_lea.hbm %s1223_s1, %s496_s19 }
  0x72   : > { %s144_s14 = sand.u32 7, %s1044_s8   ;;  %s653_s27 = scalar_lea.hbm %s133_s0, 64 }
  0x73   : > { %p654_p11 = scmp.ne.s32.totalorder %s133_s0, %s653_s27  ;;  %p656_p12 = scmp.lt.u32.totalorder %s133_s0, %s1223_s1 }
  0x74   : > { %p657_p13 = scmp.lt.u32.totalorder %s990_s23, %s653_s27  ;;  %p659_p1 = scmp.lt.u32.totalorder %s653_s27, %s133_s0 }
  0x76   : > { %p658_p0 = por %p657_p13, %p656_p12 }
  0x78   : > { %p660_p2 = por %p659_p1, %p658_p0 }
  0x7a   : > { %p661_p3 = pnand %p660_p2, %p654_p11 }
  0x7c   : > { %664 = shalt.err (!%p661_p3)  }
  0x7d   : > { %s665_s18 = scalar_lea.vmem %s1046_s13, 64  ;;  %p670_p5 = scmp.lt.s32.totalorder %s1046_s13, %s971_s10 }
  0x7e   : > { %p666_p4 = scmp.ne.s32.totalorder %s1046_s13, %s665_s18  ;;  %p671_p6 = scmp.lt.s32.totalorder %s999_s28, %s665_s18 }
  0x80   : > { %p672_p8 = por %p671_p6, %p670_p5 }
  0x82   : > { %p673_p10 = pnand %p672_p8, %p666_p4 }
  0x84   : > { %676 = shalt.err (!%p673_p10)  }
  0x85   : > { %140 = dma.hbm_to_vmem [thread:$0]  %s133_s0, 64, %s1046_s13, [#allocation3 + $0x3], %s883_s17, %s883_s17, %s884_s6 }
  0x86   : > { %s497_s8 = sshll.u32 %s143_s11, 5  ;;  %s887_s22 = smov [#allocation2 + $0x5]  }
  0x87   : > { %s146_s7 = sadd.s32 %s497_s8, %s144_s14  ;;  %s167_s25 = sshll.u32 %s887_s22, 4  ;;  %s168_s25 = int_to_ptr.vmem [resolvable:$true] %s167_s25 }
  0x88   : > { %s498_s30 = sshll.u32 %s146_s7, 4  ;;  %s158_s12 = sshrl.u32 %s1053_s26, 3 }
  0x89   : > { %s148_s21 = scalar_lea.hbm %s1223_s1, %s498_s30  ;;  %s159_s27 = sand.u32 7, %s1053_s26  }
  0x8a   : > { %s677_s9 = scalar_lea.hbm %s148_s21, 64  ;;  %p680_p12 = scmp.lt.u32.totalorder %s148_s21, %s1223_s1 }
  0x8b   : > { %p678_p11 = scmp.ne.s32.totalorder %s148_s21, %s677_s9  ;;  %p681_p13 = scmp.lt.u32.totalorder %s990_s23, %s677_s9 }
  0x8c   : > { %p683_p1 = scmp.lt.u32.totalorder %s677_s9, %s148_s21 }
  0x8d   : > { %p682_p0 = por %p681_p13, %p680_p12 }
  0x8f   : > { %p684_p2 = por %p683_p1, %p682_p0 }
  0x91   : > { %p685_p3 = pnand %p684_p2, %p678_p11 }
  0x93   : > { %688 = shalt.err (!%p685_p3)  }
  0x94   : > { %s689_s13 = scalar_lea.vmem %s1051_s16, 64  ;;  %p694_p5 = scmp.lt.s32.totalorder %s1051_s16, %s971_s10 }
  0x95   : > { %p690_p4 = scmp.ne.s32.totalorder %s1051_s16, %s689_s13  ;;  %p695_p6 = scmp.lt.s32.totalorder %s999_s28, %s689_s13 }
  0x97   : > { %p696_p8 = por %p695_p6, %p694_p5 }
  0x99   : > { %p697_p10 = pnand %p696_p8, %p690_p4 }
  0x9b   : > { %700 = shalt.err (!%p697_p10)  }
  0x9c   : > { %155 = dma.hbm_to_vmem [thread:$0]  %s148_s21, 64, %s1051_s16, [#allocation3 + $0x4], %s883_s17, %s883_s17, %s884_s6 }
  0x9d   : > { %s499_s26 = sshll.u32 %s158_s12, 5  ;;  %s171_s0 = sadd.s32 6, %s966_s5 }
  0x9e   : > { %s161_s11 = sadd.s32 %s499_s26, %s159_s27  ;;  %s172_s8 = sld [smem:[#allocation5 + %s171_s0]] }
  0x9f   : > { %s500_s14 = sshll.u32 %s161_s11, 4 }
  0xa0   : > { %s163_s30 = scalar_lea.hbm %s1223_s1, %s500_s14 }
  0xa1   : > { %s701_s19 = scalar_lea.hbm %s163_s30, 64  ;;  %p704_p12 = scmp.lt.u32.totalorder %s163_s30, %s1223_s1 }
  0xa2   : > { %p702_p11 = scmp.ne.s32.totalorder %s163_s30, %s701_s19  ;;  %p705_p13 = scmp.lt.u32.totalorder %s990_s23, %s701_s19 }
  0xa3   : > { %p707_p1 = scmp.lt.u32.totalorder %s701_s19, %s163_s30 }
  0xa4   : > { %p706_p0 = por %p705_p13, %p704_p12 }
  0xa6   : > { %p708_p2 = por %p707_p1, %p706_p0 }
  0xa8   : > { %p709_p3 = pnand %p708_p2, %p702_p11 }
  0xaa   : > { %712 = shalt.err (!%p709_p3)  }
  0xab   : > { %s713_s16 = scalar_lea.vmem %s168_s25, 64  ;;  %p718_p5 = scmp.lt.s32.totalorder %s168_s25, %s971_s10 }
  0xac   : > { %p714_p4 = scmp.ne.s32.totalorder %s168_s25, %s713_s16  ;;  %p719_p6 = scmp.lt.s32.totalorder %s999_s28, %s713_s16 }
  0xae   : > { %p720_p8 = por %p719_p6, %p718_p5 }
  0xb0   : > { %p721_p10 = pnand %p720_p8, %p714_p4 }
  0xb2   : > { %724 = shalt.err (!%p721_p10)  }
  0xb3   : > { %170 = dma.hbm_to_vmem [thread:$0]  %s163_s30, 64, %s168_s25, [#allocation3 + $0x5], %s883_s17, %s883_s17, %s884_s6 }
  0xb4   : > { %s186_s12 = sadd.s32 7, %s966_s5  ;;  %s888_s27 = smov [#allocation2 + $0x6]  }
  0xb5   : > { %s1105_s21 = sld [smem:[#allocation5 + %s186_s12]]  ;;  %s182_s15 = sshll.u32 %s888_s27, 4  ;;  %s183_s15 = int_to_ptr.vmem [resolvable:$true] %s182_s15 }
  0xb6   : > { %s173_s18 = sshrl.u32 %s172_s8, 3  ;;  %s174_s13 = sand.u32 7, %s172_s8  }
  0xb7   : > { %s501_s26 = sshll.u32 %s173_s18, 5  ;;  %s889_s14 = smov [#allocation2 + $0x7]  }
  0xb8   : > { %s176_s11 = sadd.s32 %s501_s26, %s174_s13  ;;  %s197_s7 = sshll.u32 %s889_s14, 4  ;;  %s198_s7 = int_to_ptr.vmem [resolvable:$true] %s197_s7 }
  0xb9   : > { %s502_s0 = sshll.u32 %s176_s11, 4 }
  0xba   : > { %s178_s20 = scalar_lea.hbm %s1223_s1, %s502_s0 }
  0xbb   : > { %s188_s25 = sshrl.u32 %s1105_s21, 3  ;;  %s725_s5 = scalar_lea.hbm %s178_s20, 64 }
  0xbc   : > { %p726_p11 = scmp.ne.s32.totalorder %s178_s20, %s725_s5  ;;  %p728_p12 = scmp.lt.u32.totalorder %s178_s20, %s1223_s1 }
  0xbd   : > { %p729_p13 = scmp.lt.u32.totalorder %s990_s23, %s725_s5  ;;  %p731_p1 = scmp.lt.u32.totalorder %s725_s5, %s178_s20 }
  0xbf   : > { %p730_p0 = por %p729_p13, %p728_p12 }
  0xc1   : > { %p732_p2 = por %p731_p1, %p730_p0 }
  0xc3   : > { %p733_p3 = pnand %p732_p2, %p726_p11 }
  0xc5   : > { %736 = shalt.err (!%p733_p3)  }
  0xc6   : > { %s737_s8 = scalar_lea.vmem %s183_s15, 64  ;;  %p742_p5 = scmp.lt.s32.totalorder %s183_s15, %s971_s10 }
  0xc7   : > { %p738_p4 = scmp.ne.s32.totalorder %s183_s15, %s737_s8  ;;  %p743_p6 = scmp.lt.s32.totalorder %s999_s28, %s737_s8 }
  0xc9   : > { %p744_p8 = por %p743_p6, %p742_p5 }
  0xcb   : > { %p745_p10 = pnand %p744_p8, %p738_p4 }
  0xcd   : > { %748 = shalt.err (!%p745_p10)  }
  0xce   : > { %185 = dma.hbm_to_vmem [thread:$0]  %s178_s20, 64, %s183_s15, [#allocation3 + $0x6], %s883_s17, %s883_s17, %s884_s6 }
  0xcf   : > { %s189_s16 = sand.u32 7, %s1105_s21   ;;  %s503_s12 = sshll.u32 %s188_s25, 5 }
  0xd0   : > { %s191_s27 = sadd.s32 %s503_s12, %s189_s16 }
  0xd1   : > { %s504_s18 = sshll.u32 %s191_s27, 4 }
  0xd2   : > { %s193_s11 = scalar_lea.hbm %s1223_s1, %s504_s18 }
  0xd3   : > { %s749_s0 = scalar_lea.hbm %s193_s11, 64  ;;  %p752_p12 = scmp.lt.u32.totalorder %s193_s11, %s1223_s1 }
  0xd4   : > { %p750_p11 = scmp.ne.s32.totalorder %s193_s11, %s749_s0  ;;  %p753_p13 = scmp.lt.u32.totalorder %s990_s23, %s749_s0 }
  0xd5   : > { %p755_p1 = scmp.lt.u32.totalorder %s749_s0, %s193_s11 }
  0xd6   : > { %p754_p0 = por %p753_p13, %p752_p12 }
  0xd8   : > { %p756_p2 = por %p755_p1, %p754_p0 }
  0xda   : > { %p757_p3 = pnand %p756_p2, %p750_p11 }
  0xdc   : > { %760 = shalt.err (!%p757_p3)  }
  0xdd   : > { %s761_s21 = scalar_lea.vmem %s198_s7, 64  ;;  %p766_p5 = scmp.lt.s32.totalorder %s198_s7, %s971_s10 }
  0xde   : > { %p762_p4 = scmp.ne.s32.totalorder %s198_s7, %s761_s21  ;;  %p767_p6 = scmp.lt.s32.totalorder %s999_s28, %s761_s21 }
  0xe0   : > { %p768_p8 = por %p767_p6, %p766_p5 }
  0xe2   : > { %p769_p10 = pnand %p768_p8, %p762_p4 }
  0xe4   : > { %772 = shalt.err (!%p769_p10)  }
  0xe5   : > { %200 = dma.hbm_to_vmem [thread:$0]  %s193_s11, 64, %s198_s7, [#allocation3 + $0x7], %s883_s17, %s883_s17, %s884_s6 }
  0xe6   : > { %s1238_s23 = sshll.u32 %s963_s4, 5  ;;  %s1239_s19 = sshll.u32 %s963_s4, 2 }
  0xe7   : > { %s1135_s15 = scalar_lea.vmem [#allocation6], %s1238_s23  ;;  %s1139_s20 = scalar_lea.vmem [#allocation8], %s1239_s19 }
  0xe8   : > { %843 = dma.done.wait [#allocation3], 64 }
  0xe9   : > { %844 = vsyncadd [#allocation3], 4294967232 }
  0xea   : > { %845 = dma.done.wait [#allocation3 + $0x1], 64 }
  0xeb   : > { %846 = vsyncadd [#allocation3 + $0x1], 4294967232 }
  0xec   : > { %847 = dma.done.wait [#allocation3 + $0x2], 64 }
  0xed   : > { %848 = vsyncadd [#allocation3 + $0x2], 4294967232 }
  0xee   : > { %849 = dma.done.wait [#allocation3 + $0x3], 64 }
  0xef   : > { %850 = vsyncadd [#allocation3 + $0x3], 4294967232 }
  0xf0   : > { %851 = dma.done.wait [#allocation3 + $0x4], 64 }
  0xf1   : > { %852 = vsyncadd [#allocation3 + $0x4], 4294967232 }
  0xf2   : > { %853 = dma.done.wait [#allocation3 + $0x5], 64 }
  0xf3   : > { %854 = vsyncadd [#allocation3 + $0x5], 4294967232 }
  0xf4   : > { %855 = dma.done.wait [#allocation3 + $0x6], 64 }
  0xf5   : > { %856 = vsyncadd [#allocation3 + $0x6], 4294967232 }
  0xf6   : > { %857 = dma.done.wait [#allocation3 + $0x7], 64 }
  0xf7   : > { %858 = vsyncadd [#allocation3 + $0x7], 4294967232  ;;  %s521_s10 = sshll.u32 %s877_s24, 9  ;;  %s309_s28 = sshll.u32 %s1135_s15, 4  ;;  %v218_v0 = vld [vmem:[#allocation2] sm:$0xff]  ;;  %v219_v1 = vld [vmem:[#allocation2 + $0x8] sm:$0xff]  ;;  %s1148_s28 = int_to_ptr.vmem [resolvable:$true] %s309_s28 }
  0xf8   : > { %v220_v2 = vld [vmem:[#allocation2 + $0x10] sm:$0xff]  ;;  %s1146_s7 = scalar_lea.hbm %s1224_s2, %s521_s10  ;;  %222 = vst [vmem:[%s1135_s15] sm:$0xff] %v218_v0  ;;  %v226_v3 = vrot.slane %v218_v0, 4  ;;  %223 = vst [vmem:[%s1135_s15 + $0x8] sm:$0xff] %v219_v1  ;;  %v232_v4 = vrot.slane %v219_v1, 4  ;;  %v221_v6 = vld [vmem:[#allocation2 + $0x18] sm:$0xff]  ;;  %s290_s25 = scalar_lea.sflag [#allocation7], %s963_s4 }
  0xf9   : > { %224 = vst [vmem:[%s1135_s15 + $0x10] sm:$0xff] %v220_v2  ;;  %v238_v5 = vrot.slane %v220_v2, 4  ;;  %225 = vst [vmem:[%s1135_s15 + $0x18] sm:$0xff] %v221_v6  ;;  %v244_v7 = vrot.slane %v221_v6, 4  ;;  %s773_s5 = scalar_lea.vmem %s1148_s28, 512  ;;  %s890_s30 = smov [#allocation6]  }
  0xfa   : > { %v227_v8 = vadd.f32 %v226_v3, %v218_v0  ;;  %v233_v9 = vadd.f32 %v232_v4, %v219_v1  ;;  %p774_p11 = scmp.ne.s32.totalorder %s1148_s28, %s773_s5  ;;  %s777_s9 = sshll.u32 %s890_s30, 4  ;;  %s778_s9 = int_to_ptr.vmem [resolvable:$false] %s777_s9 }
  0xfb   : > { %v239_v10 = vadd.f32 %v238_v5, %v220_v2  ;;  %s779_s8 = scalar_lea.vmem %s778_s9, 1024  ;;  %p780_p0 = scmp.lt.s32.totalorder %s1148_s28, %s778_s9 }
  0xfc   : > { %p775_p12 = pnand %p774_p11, %p953_p7  ;;  %p781_p1 = scmp.lt.s32.totalorder %s779_s8, %s773_s5 }
  0xfe   : > { %p776_p13 = pneg %p775_p12  ;;  %p782_p2 = por %p781_p1, %p780_p0 }
 0x100   : > { %p783_p3 = pnand %p782_p2, %p776_p13 }
 0x102   : > { %786 = shalt.err (!%p783_p3)
}
 0x103   : > { %s787_s16 = scalar_lea.hbm %s1146_s7, 512  ;;  %s791_s18 = scalar_lea.hbm %s1224_s2, 1024 }
 0x104   : > { %p788_p4 = scmp.ne.s32.totalorder %s1146_s7, %s787_s16  ;;  %p792_p8 = scmp.lt.u32.totalorder %s1146_s7, %s1224_s2 }
 0x105   : > { %p793_p10 = scmp.lt.u32.totalorder %s791_s18, %s787_s16  ;;  %p795_p12 = scmp.lt.u32.totalorder %s787_s16, %s1146_s7 }
 0x106   : > { %p789_p5 = pnand %p788_p4, %p953_p7 }
 0x107   : > { %p794_p11 = por %p793_p10, %p792_p8 }
 0x108   : > { %p790_p6 = pneg %p789_p5 }
 0x109   : > { %p796_p13 = por %p795_p12, %p794_p11 }
 0x10b   : > { %p797_p0 = pnand %p796_p13, %p790_p6 }
 0x10d   : > { %800 = shalt.err (!%p797_p0)
}
 0x10e   : > { %523 = dma.vmem_to_hbm [thread:$0]  (%p953_p7), %s1148_s28, 512, %s1146_s7, %s290_s25   ;;  %v245_v11 = vadd.f32 %v244_v7, %v221_v6  ;;  %v264_v12 = vlaneseq  ;;  %v228_v13 = vrot.slane %v227_v8, 2  ;;  %v234_v14 = vrot.slane %v233_v9, 2 }
 0x10f   : > { %v240_v15 = vrot.slane %v239_v10, 2  ;;  %v891_v16 = vmov 1966171168   ;;  %s522_s11 = sshll.u32 %s877_s24, 6  ;;  %s323_s0 = sshll.u32 %s1139_s20, 4  ;;  %s1183_s0 = int_to_ptr.vmem [resolvable:$true] %s323_s0 }
 0x110   : > { %v262_v17 = vunpack.c.l.s4 %v891_v16  ;;  %v246_v18 = vrot.slane %v245_v11, 2  ;;  %v229_v19 = vadd.f32 %v228_v13, %v227_v8  ;;  %v235_v20 = vadd.f32 %v234_v14, %v233_v9  ;;  %s1181_s21 = scalar_lea.hbm %s1225_s3, %s522_s11  ;;  %s295_s23 = scalar_lea.sflag [#allocation9], %s963_s4 }
 0x111   : > { %v241_v21 = vadd.f32 %v240_v15, %v239_v10  ;;  %v265_v23 = vshrl.u32 %v264_v12, 7  ;;  %vm286_vm0 = vcmp.lt.s32.totalorder %v264_v12, 512  ;;  %s801_s15 = scalar_lea.vmem %s1183_s0, 64  ;;  %s892_s19 = smov [#allocation8]  }
 0x112   : > { %v247_v22 = vadd.f32 %v246_v18, %v245_v11  ;;  %v230_v24 = vrot.slane %v229_v19, 1  ;;  %v236_v25 = vrot.slane %v235_v20, 1  ;;  %v263_v27 = vunpack.c.0.s8 %v262_v17  ;;  %p802_p1 = scmp.ne.s32.totalorder %s1183_s0, %s801_s15  ;;  %s805_s10 = sshll.u32 %s892_s19, 4  ;;  %s806_s10 = int_to_ptr.vmem [resolvable:$false] %s805_s10 }
 0x113   : > { %v242_v26 = vrot.slane %v241_v21, 1  ;;  %s807_s28 = scalar_lea.vmem %s806_s10, 128  ;;  %p808_p4 = scmp.lt.s32.totalorder %s1183_s0, %s806_s10 }
 0x114   : > { %v248_v28 = vrot.slane %v247_v22, 1  ;;  %v231_v29 = vadd.f32 %v230_v24, %v229_v19  ;;  %v237_v30 = vadd.f32 %v236_v25, %v235_v20  ;;  %v266_v36 = vsub.s32 %v263_v27, %v265_v23  ;;  %p803_p2 = pnand %p802_p1, %p953_p7  ;;  %p809_p5 = scmp.lt.s32.totalorder %s807_s28, %s801_s15 }
 0x115   : > { %v243_v31 = vadd.f32 %v242_v26, %v241_v21 }
 0x116   : > { %v249_v32 = vadd.f32 %v248_v28, %v247_v22  ;;  %v251_v33 = vmul.f32 0.125, %v231_v29  ;;  %v252_v34 = vmul.f32 0.125, %v237_v30  ;;  %p804_p3 = pneg %p803_p2  ;;  %p810_p6 = por %p809_p5, %p808_p4 }
 0x117   : > { %v253_v35 = vmul.f32 0.125, %v243_v31 }
 0x118   : > { %v254_v37 = vmul.f32 0.125, %v249_v32  ;;  %v259_v38 = vcombine.low %v251_v33, %v252_v34  ;;  %p811_p8 = pnand %p810_p6, %p804_p3 }
 0x11a   : > { %v260_v39 = vcombine.low %v253_v35, %v254_v37  ;;  %v267_v40 = vrot.slane %v259_v38, %v266_v36 }
 0x11c   : > { %v274_v41 = vrot.slane %v260_v39, %v266_v36 }
 0x11e   : > { %v275_v42 = vcombine.low %v267_v40, %v274_v41 }
 0x120   : > { %v282_v43 = vrot.slane %v275_v42, %v266_v36 }
 0x122   : > { %288 = vst.msk [vmem:[%s1139_s20] sm:$0xf] %vm286_vm0, %v282_v43 }
 0x123   : > { %814 = shalt.err (!%p811_p8)
}
 0x124   : > { %s815_s4 = scalar_lea.hbm %s1181_s21, 64  ;;  %s819_s6 = scalar_lea.hbm %s1225_s3, 128 }
 0x125   : > { %p816_p10 = scmp.ne.s32.totalorder %s1181_s21, %s815_s4  ;;  %p820_p13 = scmp.lt.u32.totalorder %s1181_s21, %s1225_s3 }
 0x126   : > { %p821_p0 = scmp.lt.u32.totalorder %s819_s6, %s815_s4  ;;  %p823_p2 = scmp.lt.u32.totalorder %s815_s4, %s1181_s21 }
 0x127   : > { %p817_p11 = pnand %p816_p10, %p953_p7 }
 0x128   : > { %p822_p1 = por %p821_p0, %p820_p13 }
 0x129   : > { %p818_p12 = pneg %p817_p11 }
 0x12a   : > { %p824_p3 = por %p823_p2, %p822_p1 }
 0x12c   : > { %p825_p4 = pnand %p824_p3, %p818_p12 }
 0x12e   : > { %828 = shalt.err (!%p825_p4)
}
 0x12f   : > { %524 = dma.vmem_to_hbm [thread:$0]  (%p953_p7), %s1183_s0, 64, %s1181_s21, %s295_s23  }
 0x130 PF: > { %s1240_s5 = sld [smem:[#allocation29_spill]]  ;;  %p534_p5 = scmp.ge.s32.totalorder %s877_s24, 1 }
 0x132   : > { %p528_p6 = pnand %p534_p5, %p957_p9 }
 0x136   : > { %s335_s9 = sand.u32 1, %s1240_s5  }
 0x137   : > { %s336_s8 = scalar_lea.sflag [#allocation7], %s335_s9 }
 0x138   : > { %860 = dma.done.wait (!%p528_p6), %s336_s8, 512  }
 0x139   : > { %862 = vsyncadd (!%p528_p6), %s336_s8, 4294966784  ;;  %s345_s16 = scalar_lea.sflag [#allocation9], %s335_s9 }
 0x13a   : > { %864 = dma.done.wait (!%p528_p6), %s345_s16, 64  }
 0x13b   : > { %866 = vsyncadd (!%p528_p6), %s345_s16, 4294967232  ;;  %s1242_s24 = sld [smem:[#allocation31_spill]]  ;;  %s1243_s22 = sld [smem:[#allocation30_spill]] }
 0x13c   : > { %s1244_s23 = sld [smem:[#allocation32_spill]] }
 0x141   : > { %p21_p8 = scmp.ge.s32.totalorder %s1242_s24, 3  }
 0x143   :  { %23 = sbr.rel (!%p21_p8) target bundleno = 17 (0x11), region = 90 }
 0x14a   :  { %350 = vsyncpa [#allocation7], 1 }
 0x14b   :  { %352 = vsyncpa [#allocation7 + $0x1], 1 }
 0x14c   :  { %353 = vsyncpa [#allocation9], 1 }
 0x14d   :  { %355 = vsyncpa [#allocation9 + $0x1], 1 }
 0x14e   :  { %356 = vsyncmov [#allocation3] }
 0x151   :  { %s357_s29 = vpop.sfrf %356 }
 0x152   :  { %p513_p7 = scmp.ne.s32.totalorder %s357_s29, 0 }
 0x154   :  { %361 = shalt.err (%p513_p7)  }
 0x155   :  { %363 = vsyncmov [#allocation3 + $0x1] }
 0x158   :  { %s364_s12 = vpop.sfrf %363 }
 0x159   :  { %p514_p9 = scmp.ne.s32.totalorder %s364_s12, 0 }
 0x15b   :  { %368 = shalt.err (%p514_p9)  }
 0x15c   :  { %370 = vsyncmov [#allocation3 + $0x2] }
 0x15f   :  { %s371_s27 = vpop.sfrf %370 }
 0x160   :  { %p515_p10 = scmp.ne.s32.totalorder %s371_s27, 0 }
 0x162   :  { %375 = shalt.err (%p515_p10)  }
 0x163   :  { %377 = vsyncmov [#allocation3 + $0x3] }
 0x166   :  { %s378_s18 = vpop.sfrf %377 }
 0x167   :  { %p516_p11 = scmp.ne.s32.totalorder %s378_s18, 0 }
 0x169   :  { %382 = shalt.err (%p516_p11)  }
 0x16a   :  { %384 = vsyncmov [#allocation3 + $0x4] }
 0x16d   :  { %s385_s1 = vpop.sfrf %384 }
 0x16e   :  { %p517_p12 = scmp.ne.s32.totalorder %s385_s1, 0 }
 0x170   :  { %389 = shalt.err (%p517_p12)  }
 0x171   :  { %391 = vsyncmov [#allocation3 + $0x5] }
 0x174   :  { %s392_s2 = vpop.sfrf %391 }
 0x175   :  { %p518_p13 = scmp.ne.s32.totalorder %s392_s2, 0 }
 0x177   :  { %396 = shalt.err (%p518_p13)  }
 0x178   :  { %398 = vsyncmov [#allocation3 + $0x6] }
 0x17b   :  { %s399_s3 = vpop.sfrf %398 }
 0x17c   :  { %p519_p0 = scmp.ne.s32.totalorder %s399_s3, 0 }
 0x17e   :  { %403 = shalt.err (%p519_p0)  }
 0x17f   :  { %405 = vsyncmov [#allocation3 + $0x7] }
 0x182   :  { %s406_s24 = vpop.sfrf %405 }
 0x183   :  { %p520_p1 = scmp.ne.s32.totalorder %s406_s24, 0 }
 0x185   :  { %410 = shalt.err (%p520_p1)  }

</bundles_post_ra>
